<compile_context>
chip_gen: v6e
topology: v6e:2x2x1
jax: 0.10.0
libtpu: 0.0.40
codegen_flags: <defaults>
</compile_context>

<pallas_src>
import functools
import math

import jax
import jax.numpy as jnp
from jax.experimental import pallas as pl
from jax.experimental.pallas import tpu as pltpu


_LANE = 512           # lane-dense last dim (multiple of 128)
_MAX_TILE_ROWS = 1024  # 1024 x 512 x 4B = 2 MiB per f32 block


def _quant_kernel(coef_ref, x_ref, o_ref, *, isint):
    # coef_ref (SMEM, shape (2,) f32): [0] = half_level/scale, [1] = scale/half_level
    x = x_ref[...].astype(jnp.float32)
    q = jnp.round(x * coef_ref[0])          # quantize (round-half-to-even == torch.round)
    if isint == 0:
        q = q * coef_ref[1]                 # dequantize back to float range
    o_ref[...] = q.astype(o_ref.dtype)


def layer_quant_noise_forward(x, *, bit_level=4, isint=0, clamp_std=0,
                              noise_scale=0.0):
    """Pallas implementation of Layer_Quant_noise(bit_level, isint, ...).forward."""
    del clamp_std, noise_scale  # stored by the module but unused by its forward()
    half_level = 2.0 ** bit_level / 2.0 - 1.0
    if half_level <= 0:
        return x
    hl = half_level + 0.4999  # boundary_refine=True (static Python float)

    orig_shape = x.shape
    orig_dtype = x.dtype
    total = math.prod(orig_shape)

    # Global abs-max as a single XLA reduction pass. If scale == 0 then x is
    # identically zero, and round(0 * c1) * c2 == 0 reproduces the passthrough.
    scale = jnp.max(jnp.abs(x)).astype(jnp.float32)
    safe_scale = jnp.where(scale == 0.0, jnp.float32(1.0), scale)
    coefs = jnp.stack([jnp.float32(hl) / safe_scale,      # c1
                       safe_scale / jnp.float32(hl)])     # c2

    # Lane-dense 2-D slab: (padded_rows, _LANE); padded_rows is a multiple of the
    # row tile (itself a multiple of 8). Zero padding quantizes to zero and is
    # sliced away afterwards.
    rows = -(-total // _LANE)
    tr = min(_MAX_TILE_ROWS, ((rows + 7) // 8) * 8)
    padded_rows = -(-rows // tr) * tr
    padded_total = padded_rows * _LANE

    x_flat = x.reshape(-1)
    if padded_total != total:
        x_flat = jnp.pad(x_flat, (0, padded_total - total))
    x2 = x_flat.reshape(padded_rows, _LANE)

    n_tiles = padded_rows // tr
    itemsize = jnp.dtype(orig_dtype).itemsize

    kernel = functools.partial(_quant_kernel, isint=isint)
    out = pl.pallas_call(
        kernel,
        out_shape=jax.ShapeDtypeStruct((padded_rows, _LANE), orig_dtype),
        grid=(n_tiles,),
        in_specs=[
            pl.BlockSpec(memory_space=pltpu.MemorySpace.SMEM),   # (2,) scalars
            pl.BlockSpec((tr, _LANE), lambda i: (i, 0)),
        ],
        out_specs=pl.BlockSpec((tr, _LANE), lambda i: (i, 0)),
        compiler_params=pltpu.CompilerParams(
            dimension_semantics=("parallel",)),
        cost_estimate=pl.CostEstimate(
            flops=3 * padded_total,
            transcendentals=0,
            bytes_accessed=2 * padded_total * itemsize),
    )(coefs, x2)

    return out.reshape(-1)[:total].reshape(orig_shape)


def _reference(x, *, bit_level=4, isint=0):
    """Pure-JAX reference mirroring data_quantization_sym defaults.

    Uses the same scalar factoring as the kernel:
      round(x / s * h) * s / h == round(x * (h / s)) * (s / h)
    (identical up to scalar reassociation of constants).
    """
    half_level = 2.0 ** bit_level / 2.0 - 1.0
    if half_level <= 0:
        return x
    hl = half_level + 0.4999
    scale = jnp.max(jnp.abs(x))
    safe = jnp.where(scale == 0.0, 1.0, scale)
    q = jnp.round(x * (hl / safe))
    if isint == 0:
        q = q * (safe / hl)
    return jnp.where(scale == 0.0, x, q)


if __name__ == "__main__":
    key = jax.random.PRNGKey(0)
    # Module config: bit_level=4, isint=0, clamp_std=0, noise_scale=0.0
    bit_level, isint = 4, 0

    x = jax.random.normal(key, (2, 4, 16, 16), dtype=jnp.float32)

    fwd = jax.jit(functools.partial(layer_quant_noise_forward,
                                    bit_level=bit_level, isint=isint,
                                    clamp_std=0, noise_scale=0.0))
    y = jax.block_until_ready(fwd(x))

    y_ref = _reference(x, bit_level=bit_level, isint=isint)
    assert y.shape == x.shape and y.dtype == x.dtype
    assert jnp.allclose(y, y_ref, atol=1e-5, rtol=1e-5)

    print("KERNEL_OK")
</pallas_src>

<mosaic_0001>
module attributes {stable_mosaic.version = 11 : i64} {
  func.func @_quant_kernel(%arg0: i32, %arg1: memref<2xf32, #tpu.memory_space<smem>>, %arg2: memref<8x512xf32, #tpu.memory_space<vmem>>, %arg3: memref<8x512xf32, #tpu.memory_space<vmem>>) attributes {dimension_semantics = [#tpu.dimension_semantics<parallel>], iteration_bounds = array<i64: 1>, scalar_prefetch = 0 : i64, scratch_operands = 0 : i64, tpu.core_type = #tpu.core_type<tc>, window_params = [{transform_indices = @transform_0, window_bounds = array<i64: 2>}, {transform_indices = @transform_1, window_bounds = array<i64: 8, 512>}, {transform_indices = @transform_2, window_bounds = array<i64: 8, 512>}]} {
    %c0 = arith.constant 0 : index
    %c0_0 = arith.constant 0 : index
    %0 = vector.load %arg2[%c0, %c0_0] : memref<8x512xf32, #tpu.memory_space<vmem>>, vector<8x512xf32>
    %c0_1 = arith.constant 0 : index
    %1 = memref.load %arg1[%c0_1] : memref<2xf32, #tpu.memory_space<smem>>
    %2 = vector.broadcast %1 : f32 to vector<8x512xf32>
    %3 = arith.mulf %0, %2 : vector<8x512xf32>
    %4 = math.roundeven %3 : vector<8x512xf32>
    %c1 = arith.constant 1 : index
    %5 = memref.load %arg1[%c1] : memref<2xf32, #tpu.memory_space<smem>>
    %6 = vector.broadcast %5 : f32 to vector<8x512xf32>
    %7 = arith.mulf %4, %6 : vector<8x512xf32>
    %c0_2 = arith.constant 0 : index
    %c0_3 = arith.constant 0 : index
    %8 = vector.load %arg3[%c0_2, %c0_3] : memref<8x512xf32, #tpu.memory_space<vmem>>, vector<8x512xf32>
    tpu.vector_store %arg3[%c0_2, %c0_3], %7 {strides = array<i32>} : memref<8x512xf32, #tpu.memory_space<vmem>>, vector<8x512xf32>,
    return
  }
  func.func @transform_0(%arg0: i32) -> i32 {
    %c0_i32 = arith.constant 0 : i32
    %c0_i32_0 = arith.constant 0 : i32
    return %c0_i32 : i32
  }
  func.func @transform_1(%arg0: i32) -> (i32, i32) {
    %c0_i32 = arith.constant 0 : i32
    %c0_i32_0 = arith.constant 0 : i32
    return %arg0, %c0_i32 : i32, i32
  }
  func.func @transform_2(%arg0: i32) -> (i32, i32) {
    %c0_i32 = arith.constant 0 : i32
    %c0_i32_0 = arith.constant 0 : i32
    return %arg0, %c0_i32 : i32, i32
  }
}

</mosaic_0001>

<bundles_post_ra>
// kernel: layer_quant_noise_forward.1
= control target key start
LH: loop header
LB: loop body
LE: loop exit
PB: predicated region body
PF: predicated region fallthrough
CT: control target
= control target key end

     0   :  { %7 = vsyncpa [#allocation3], 0  ;;  %s156_s0 = inlined_call_operand.vmem [shape: f32[2], index: 0, kind: input, shape index: {}]   ;;  %s157_s1 = inlined_call_operand.vmem [shape: f32[8,512], index: 1, kind: input, shape index: {}]   ;;  %s158_s2 = inlined_call_operand.vmem [shape: f32[8,512], index: 2, kind: output, shape index: {}]  }
   0x1   :  { %s14_s11 = sshll.u32 %s156_s0, 4  ;;  %s15_s11 = int_to_ptr.vmem [resolvable:$true] %s14_s11 }
   0x2   :  { %s87_s12 = scalar_lea.vmem %s15_s11, 16  ;;  %p92_p1 = scmp.lt.s32.totalorder %s15_s11, %s15_s11 }
   0x3   :  { %p88_p0 = scmp.ne.s32.totalorder %s15_s11, %s87_s12  ;;  %p93_p2 = scmp.lt.s32.totalorder %s87_s12, %s87_s12 }
   0x5   :  { %p94_p3 = por %p93_p2, %p92_p1 }
   0x7   :  { %p95_p4 = pnand %p94_p3, %p88_p0 }
   0x9   :  { %98 = shalt.err (!%p95_p4)
}
   0xa   :  { %s101_s13 = smov [#allocation2]  }
   0xb   :  { %17 = dma.vmem_to_smem %s15_s11, 16, %s101_s13, [#allocation3]  }
   0xc   :  { %99 = dma.done.wait [#allocation3], 16  }
   0xd   :  { %100 = vsyncadd [#allocation3], 4294967280 }
   0xe   :  { %23 = sfence }
   0xf   :  { %s28_s14 = sld [smem:[#allocation2]]  ;;  %v24_v0 = vld [vmem:[%s157_s1] sm:$0xff]  ;;  %v25_v1 = vld [vmem:[%s157_s1 + $0x8] sm:$0xff]  ;;  %v26_v2 = vld [vmem:[%s157_s1 + $0x10] sm:$0xff] }
  0x10   :  { %s53_s20 = sld [smem:[#allocation2 + $0x1]]  ;;  %v27_v4 = vld [vmem:[%s157_s1 + $0x18] sm:$0xff] }
  0x15   :  { %v29_v3 = vstv %s28_s14 }
  0x16   :  { %v30_v5 = vmul.f32 %v29_v3, %v24_v0  ;;  %v31_v6 = vmul.f32 %v29_v3, %v25_v1  ;;  %v32_v7 = vmul.f32 %v29_v3, %v26_v2  ;;  %v33_v11 = vmul.f32 %v29_v3, %v27_v4 }
  0x17   :  { %v39_v25 = vstv %s53_s20 }
  0x18   :  { %v54_v8 = vand.u32 2147483647, %v30_v5  ;;  %v56_v9 = vcvt.f32.s32 %v30_v5  ;;  %v62_v10 = vand.u32 2147483647, %v31_v6  ;;  %v64_v12 = vcvt.f32.s32 %v31_v6 }
  0x19   :  { %v72_v13 = vcvt.f32.s32 %v32_v7  ;;  %v59_v15 = vand.u32 2147483648, %v30_v5  ;;  %v70_v16 = vand.u32 2147483647, %v32_v7  ;;  %v67_v18 = vand.u32 2147483648, %v31_v6 }
  0x1a   :  { %v57_v14 = vcvt.s32.f32 %v56_v9  ;;  %v65_v17 = vcvt.s32.f32 %v64_v12  ;;  %v75_v20 = vand.u32 2147483648, %v32_v7  ;;  %vm132_vm0 = vcmp.lt.f32.partialorder %v54_v8, 8388608.0 }
  0x1b   :  { %v73_v19 = vcvt.s32.f32 %v72_v13  ;;  %vm136_vm1 = vcmp.lt.f32.partialorder %v62_v10, 8388608.0  ;;  %v80_v24 = vcvt.f32.s32 %v33_v11  ;;  %v78_v28 = vand.u32 2147483647, %v33_v11 }
  0x1c   :  { %v58_v22 = vand.u32 2147483647, %v57_v14  ;;  %v66_v26 = vand.u32 2147483647, %v65_v17  ;;  %vm71_vm2 = vcmp.lt.f32.partialorder %v70_v16, 8388608.0  ;;  %v83_v31 = vand.u32 2147483648, %v33_v11 }
  0x1d   :  { %v74_v27 = vand.u32 2147483647, %v73_v19  ;;  %v81_v30 = vcvt.s32.f32 %v80_v24  ;;  %vm79_vm3 = vcmp.lt.f32.partialorder %v78_v28, 8388608.0 }
  0x1e   :  { %v60_v29 = vor.u32 %v59_v15, %v58_v22  ;;  %v68_v32 = vor.u32 %v67_v18, %v66_v26 }
  0x1f   :  { %v76_v33 = vor.u32 %v75_v20, %v74_v27  ;;  %v82_v35 = vand.u32 2147483647, %v81_v30 }
  0x20   :  { %v61_v34 = vsel %vm132_vm0, %v60_v29, %v30_v5  ;;  %v69_v37 = vsel %vm136_vm1, %v68_v32, %v31_v6 }
  0x21   :  { %v40_v36 = vmul.f32 %v61_v34, %v39_v25  ;;  %v77_v38 = vsel %vm71_vm2, %v76_v33, %v32_v7  ;;  %v41_v39 = vmul.f32 %v69_v37, %v39_v25  ;;  %v84_v41 = vor.u32 %v83_v31, %v82_v35 }
  0x22   :  { %v42_v40 = vmul.f32 %v77_v38, %v39_v25 }
  0x23   :  { %44 = vst [vmem:[%s158_s2] sm:$0xff] %v40_v36  ;;  %45 = vst [vmem:[%s158_s2 + $0x8] sm:$0xff] %v41_v39  ;;  %v85_v42 = vsel %vm79_vm3, %v84_v41, %v33_v11 }
  0x24   :  { %46 = vst [vmem:[%s158_s2 + $0x10] sm:$0xff] %v42_v40  ;;  %v43_v43 = vmul.f32 %v85_v42, %v39_v25 }
  0x26   :  { %47 = vst [vmem:[%s158_s2 + $0x18] sm:$0xff] %v43_v43 }
  0x27   :  { %52 = vsyncpa [#allocation3], 1 }

</bundles_post_ra>
